<compile_context>
chip_gen: v6e
topology: v6e:2x2x1
jax: 0.10.0
libtpu: 0.0.40
codegen_flags: <defaults>
</compile_context>

<pallas_src>
import functools

import jax
import jax.numpy as jnp
from jax.experimental import pallas as pl
from jax.experimental.pallas import tpu as pltpu

BN_EPS = 1e-3
C_PAD = 128          # lane-pad the output-channel axis to a full vreg width
KSIZE = 3


def _round_up(x, m):
    return (x + m - 1) // m * m


def _pick_tile_r(rows, n):
    """Row-tile size: aim for >= 8 total grid steps (>= 4 per v7x TensorCore) so the
    pipeline double-buffers on both cores, while keeping tiles as large as possible
    to amortize the ~0.35 us per-step overhead.  Per-step VMEM footprint is
    TILE_R*(9*C_in*2 + 128*6) bytes, i.e. < 1 MiB even at TILE_R=1024."""
    tile = 1024
    while tile > 8 and n * ((rows + tile - 1) // tile) < 8:
        tile //= 2
    return tile


def _stats_kernel(x_ref, w_ref, stats_ref, *, tile_r, rows_valid, need_mask):
    """One fused (1x1 ∘ 3x3) conv matmul on a row tile + per-tile channel sums.

    x_ref: [1, TILE_R, 9*C_in] bf16 tap-packed input rows.
    w_ref: [9*C_in, C_PAD] bf16 folded weight.
    stats_ref: [1, 2, C_PAD] f32 -> row 0 = sum, row 1 = sum of squares.
    """
    z = jnp.dot(x_ref[0], w_ref[...], preferred_element_type=jnp.float32)
    if need_mask:  # mask zero-padded tail rows out of the BN statistics
        row = (pl.program_id(1) * tile_r
               + jax.lax.broadcasted_iota(jnp.int32, z.shape, 0))
        z = jnp.where(row < rows_valid, z, 0.0)
    stats_ref[0] = jnp.concatenate(
        [jnp.sum(z, axis=0, keepdims=True),
         jnp.sum(z * z, axis=0, keepdims=True)], axis=0)


def _apply_kernel(x_ref, w_ref, bn_ref, out_ref):
    """Recompute the conv on a row tile, apply BatchNorm (affine=False) + ReLU."""
    z = jnp.dot(x_ref[0], w_ref[...], preferred_element_type=jnp.float32)
    y = (z - bn_ref[0:1, :]) * bn_ref[1:2, :]              # f32 BN math
    out_ref[0] = jnp.maximum(y, 0.0).astype(out_ref.dtype)  # ReLU, bf16 lane-dense store
    # TODO(synk): BatchNorm running-stats update (stateful training side effect)
    # is not modeled; only the forward activation is reproduced.


def basic_conv2d(x_nchw, w_conv, w_1x1, b_1x1):
    """x_nchw: [N, C_in, H, W]; w_conv: [C_out, C_in, 3, 3] (torch OIHW);
    w_1x1: [C_out, C_out, 1, 1]; b_1x1: [C_out].  Returns [N, C_out, H, W] f32."""
    del b_1x1  # Exactly cancelled by BatchNorm(affine=False) mean subtraction.
    n, c_in, h, w = x_nchw.shape
    c_out = w_conv.shape[0]
    rows = h * w
    k = KSIZE * KSIZE * c_in                    # MXU contraction depth (tap-packed)

    # ---- host-side prep (algebraic folding + layout; all tiny) ----
    # Fold 1x1 into 3x3: W_fold[o2,c,dh,dw] = sum_o w1x1[o2,o] * w3x3[o,c,dh,dw]
    wf = (w_1x1.reshape(c_out, c_out).astype(jnp.float32)
          @ w_conv.reshape(c_out, c_in * KSIZE * KSIZE).astype(jnp.float32))
    wf = wf.reshape(c_out, c_in, KSIZE, KSIZE)
    # Weight rows ordered (dh, dw, c) to match the tap-packed slab columns.
    w_mat = jnp.transpose(wf, (2, 3, 1, 0)).reshape(k, c_out)
    w_mat = jnp.pad(w_mat, ((0, 0), (0, C_PAD - c_out))).astype(jnp.bfloat16)

    # Tap-packed ("im2col") slab: for every output pixel, its 3x3 window flattened
    # into the contraction axis.  [N, H*W, 9*C_in] bf16.
    x_nhwc = jnp.transpose(x_nchw, (0, 2, 3, 1)).astype(jnp.bfloat16)
    xp = jnp.pad(x_nhwc, ((0, 0), (1, 1), (1, 1), (0, 0)))
    taps = [xp[:, dh:dh + h, dw:dw + w, :]
            for dh in range(KSIZE) for dw in range(KSIZE)]
    slab = jnp.concatenate(taps, axis=-1).reshape(n, rows, k)

    tile_r = _pick_tile_r(rows, n)
    rows_p = _round_up(rows, tile_r)
    if rows_p != rows:
        slab = jnp.pad(slab, ((0, 0), (0, rows_p - rows), (0, 0)))
    nt = rows_p // tile_r

    cparams = pltpu.CompilerParams(
        dimension_semantics=("parallel", "parallel"))   # both axes split across TCs
    x_spec = pl.BlockSpec((1, tile_r, k), lambda i, j: (i, j, 0))
    w_spec = pl.BlockSpec((k, C_PAD), lambda i, j: (0, 0))
    conv_flops = n * rows_p * 2 * k * C_PAD

    # ---- pass 1: per-(image, row-tile) channel sum / sum-of-squares ----
    stats = pl.pallas_call(
        functools.partial(_stats_kernel, tile_r=tile_r, rows_valid=rows,
                          need_mask=(rows_p != rows)),
        out_shape=jax.ShapeDtypeStruct((n * nt, 2, C_PAD), jnp.float32),
        grid=(n, nt),
        in_specs=[x_spec, w_spec],
        out_specs=pl.BlockSpec((1, 2, C_PAD), lambda i, j: (i * nt + j, 0, 0)),
        compiler_params=cparams,
        cost_estimate=pl.CostEstimate(
            flops=conv_flops, transcendentals=0,
            bytes_accessed=slab.size * 2 + w_mat.size * 2 + n * nt * 2 * C_PAD * 4),
    )(slab, w_mat)

    # ---- tiny global reduction + BN parameters (biased variance, eps=1e-3) ----
    tot = jnp.sum(stats, axis=0)                        # [2, C_PAD]
    count = float(n * rows)
    mean = tot[0] / count
    var = jnp.maximum(tot[1] / count - mean * mean, 0.0)
    invstd = jax.lax.rsqrt(var + BN_EPS)
    bn = jnp.stack([mean, invstd], axis=0)              # [2, C_PAD] f32

    # ---- pass 2: recompute conv, apply BN + ReLU with lane-dense bf16 stores ----
    out_flat = pl.pallas_call(
        _apply_kernel,
        out_shape=jax.ShapeDtypeStruct((n, rows_p, C_PAD), jnp.bfloat16),
        grid=(n, nt),
        in_specs=[x_spec, w_spec,
                  pl.BlockSpec((2, C_PAD), lambda i, j: (0, 0))],
        out_specs=pl.BlockSpec((1, tile_r, C_PAD), lambda i, j: (i, j, 0)),
        compiler_params=cparams,
        cost_estimate=pl.CostEstimate(
            flops=conv_flops, transcendentals=0,
            bytes_accessed=slab.size * 2 + w_mat.size * 2
            + n * rows_p * C_PAD * 2),
    )(slab, w_mat, bn)

    # Drop padded lanes / pad rows, back to NCHW f32 (module semantics).
    out = out_flat[:, :rows, :c_out].reshape(n, h, w, c_out)
    return jnp.transpose(out, (0, 3, 1, 2)).astype(jnp.float32)


def reference(x_nchw, w_conv, w_1x1, b_1x1):
    """Pure-JAX (f32) reference for validation."""
    xp = jnp.pad(x_nchw, ((0, 0), (0, 0), (1, 1), (1, 1)))
    z = jax.lax.conv_general_dilated(
        xp, w_conv, window_strides=(1, 1), padding="VALID",
        dimension_numbers=("NCHW", "OIHW", "NCHW"))
    z = jax.lax.conv_general_dilated(
        z, w_1x1, window_strides=(1, 1), padding="VALID",
        dimension_numbers=("NCHW", "OIHW", "NCHW")) + b_1x1.reshape(1, -1, 1, 1)
    mean = jnp.mean(z, axis=(0, 2, 3), keepdims=True)
    var = jnp.mean((z - mean) ** 2, axis=(0, 2, 3), keepdims=True)
    y = (z - mean) * jax.lax.rsqrt(var + BN_EPS)
    return jnp.maximum(y, 0.0)


if __name__ == "__main__":
    N, C_IN, C_OUT, H, W = 2, 4, 8, 16, 16

    key = jax.random.PRNGKey(0)
    kx, k1, k2, k3 = jax.random.split(key, 4)
    x = jax.random.normal(kx, (N, C_IN, H, W), dtype=jnp.float32)
    w_conv = jax.random.normal(k1, (C_OUT, C_IN, 3, 3), dtype=jnp.float32) * 0.1
    w_1x1 = jax.random.normal(k2, (C_OUT, C_OUT, 1, 1), dtype=jnp.float32) * 0.1
    b_1x1 = jax.random.normal(k3, (C_OUT,), dtype=jnp.float32) * 0.1

    y = jax.jit(basic_conv2d)(x, w_conv, w_1x1, b_1x1)
    jax.block_until_ready(y)

    y_ref = reference(x, w_conv, w_1x1, b_1x1)
    assert y.shape == (N, C_OUT, H, W)
    # bf16 MXU inputs + bf16 activation store (f32 accumulation / f32 BN math).
    err = float(jnp.max(jnp.abs(y - y_ref)))
    assert jnp.allclose(y, y_ref, atol=5e-2, rtol=5e-2), err

    print("KERNEL_OK")
</pallas_src>

<mosaic_0001>
module attributes {stable_mosaic.version = 11 : i64} {
  func.func @_stats_kernel(%arg0: i32, %arg1: i32, %arg2: memref<1x64x36xbf16, #tpu.memory_space<vmem>>, %arg3: memref<36x128xbf16, #tpu.memory_space<vmem>>, %arg4: memref<1x2x128xf32, #tpu.memory_space<vmem>>) attributes {dimension_semantics = [#tpu.dimension_semantics<parallel>, #tpu.dimension_semantics<parallel>], iteration_bounds = array<i64: 2, 4>, scalar_prefetch = 0 : i64, scratch_operands = 0 : i64, tpu.core_type = #tpu.core_type<tc>, window_params = [{transform_indices = @transform_0, window_bounds = array<i64: 1, 64, 36>}, {pipeline_mode = #tpu.pipeline_mode<synchronous>, transform_indices = @transform_1, window_bounds = array<i64: 36, 128>}, {transform_indices = @transform_2, window_bounds = array<i64: 1, 2, 128>}]} {
    %c0 = arith.constant 0 : index
    %c0_0 = arith.constant 0 : index
    %c0_1 = arith.constant 0 : index
    %0 = vector.load %arg2[%c0, %c0_0, %c0_1] : memref<1x64x36xbf16, #tpu.memory_space<vmem>>, vector<1x64x36xbf16>
    %1 = vector.shape_cast %0 : vector<1x64x36xbf16> to vector<64x36xbf16>
    %c0_2 = arith.constant 0 : index
    %c0_3 = arith.constant 0 : index
    %2 = vector.load %arg3[%c0_2, %c0_3] : memref<36x128xbf16, #tpu.memory_space<vmem>>, vector<36x128xbf16>
    %cst = arith.constant dense<0.000000e+00> : vector<64x128xf32>
    %3 = tpu.matmul %1, %2, %cst {dimension_numbers = #tpu.dot_dimension_numbers<[1], [0], [0], [1], [0, 0, 1, 1], [], []>} : vector<64x36xbf16>, vector<36x128xbf16>, vector<64x128xf32> -> vector<64x128xf32>
    %cst_4 = arith.constant dense<0.000000e+00> : vector<128xf32>
    %4 = vector.multi_reduction <add>, %3, %cst_4 [0] : vector<64x128xf32> to vector<128xf32>
    %5 = vector.shape_cast %4 : vector<128xf32> to vector<1x128xf32>
    %6 = arith.mulf %3, %3 : vector<64x128xf32>
    %cst_5 = arith.constant dense<0.000000e+00> : vector<128xf32>
    %7 = vector.multi_reduction <add>, %6, %cst_5 [0] : vector<64x128xf32> to vector<128xf32>
    %8 = vector.shape_cast %7 : vector<128xf32> to vector<1x128xf32>
    %9 = tpu.concatenate %5, %8 in 0 : vector<1x128xf32>, vector<1x128xf32> -> vector<2x128xf32>
    %c0_6 = arith.constant 0 : index
    %c0_7 = arith.constant 0 : index
    %c0_8 = arith.constant 0 : index
    %10 = vector.load %arg4[%c0_6, %c0_7, %c0_8] : memref<1x2x128xf32, #tpu.memory_space<vmem>>, vector<1x2x128xf32>
    %11 = vector.shape_cast %10 : vector<1x2x128xf32> to vector<2x128xf32>
    %12 = vector.shape_cast %9 : vector<2x128xf32> to vector<1x2x128xf32>
    tpu.vector_store %arg4[%c0_6, %c0_7, %c0_8], %12 {strides = array<i32>} : memref<1x2x128xf32, #tpu.memory_space<vmem>>, vector<1x2x128xf32>,
    return
  }
  func.func @transform_0(%arg0: i32, %arg1: i32) -> (i32, i32, i32) {
    %c0_i32 = arith.constant 0 : i32
    %c0_i32_0 = arith.constant 0 : i32
    return %arg0, %arg1, %c0_i32 : i32, i32, i32
  }
  func.func @transform_1(%arg0: i32, %arg1: i32) -> (i32, i32) {
    %c0_i32 = arith.constant 0 : i32
    %c0_i32_0 = arith.constant 0 : i32
    %c0_i32_1 = arith.constant 0 : i32
    return %c0_i32, %c0_i32_0 : i32, i32
  }
  func.func @transform_2(%arg0: i32, %arg1: i32) -> (i32, i32, i32) {
    %c4_i32 = arith.constant 4 : i32
    %0 = arith.muli %arg0, %c4_i32 : i32
    %1 = arith.addi %0, %arg1 : i32
    %c0_i32 = arith.constant 0 : i32
    %c0_i32_0 = arith.constant 0 : i32
    %c0_i32_1 = arith.constant 0 : i32
    return %1, %c0_i32, %c0_i32_0 : i32, i32, i32
  }
}

module attributes {stable_mosaic.version = 11 : i64} {
  func.func @_apply_kernel(%arg0: i32, %arg1: i32, %arg2: memref<1x64x36xbf16, #tpu.memory_space<vmem>>, %arg3: memref<36x128xbf16, #tpu.memory_space<vmem>>, %arg4: memref<2x128xf32, #tpu.memory_space<vmem>>, %arg5: memref<1x64x128xbf16, #tpu.memory_space<vmem>>) attributes {dimension_semantics = [#tpu.dimension_semantics<parallel>, #tpu.dimension_semantics<parallel>], iteration_bounds = array<i64: 2, 4>, scalar_prefetch = 0 : i64, scratch_operands = 0 : i64, tpu.core_type = #tpu.core_type<tc>, window_params = [{transform_indices = @transform_0, window_bounds = array<i64: 1, 64, 36>}, {pipeline_mode = #tpu.pipeline_mode<synchronous>, transform_indices = @transform_1, window_bounds = array<i64: 36, 128>}, {pipeline_mode = #tpu.pipeline_mode<synchronous>, transform_indices = @transform_2, window_bounds = array<i64: 2, 128>}, {transform_indices = @transform_3, window_bounds = array<i64: 1, 64, 128>}]} {
    %c0 = arith.constant 0 : index
    %c0_0 = arith.constant 0 : index
    %c0_1 = arith.constant 0 : index
    %0 = vector.load %arg2[%c0, %c0_0, %c0_1] : memref<1x64x36xbf16, #tpu.memory_space<vmem>>, vector<1x64x36xbf16>
    %1 = vector.shape_cast %0 : vector<1x64x36xbf16> to vector<64x36xbf16>
    %c0_2 = arith.constant 0 : index
    %c0_3 = arith.constant 0 : index
    %2 = vector.load %arg3[%c0_2, %c0_3] : memref<36x128xbf16, #tpu.memory_space<vmem>>, vector<36x128xbf16>
    %cst = arith.constant dense<0.000000e+00> : vector<64x128xf32>
    %3 = tpu.matmul %1, %2, %cst {dimension_numbers = #tpu.dot_dimension_numbers<[1], [0], [0], [1], [0, 0, 1, 1], [], []>} : vector<64x36xbf16>, vector<36x128xbf16>, vector<64x128xf32> -> vector<64x128xf32>
    %c0_4 = arith.constant 0 : index
    %c0_5 = arith.constant 0 : index
    %4 = vector.load %arg4[%c0_4, %c0_5] : memref<2x128xf32, #tpu.memory_space<vmem>>, vector<1x128xf32>
    %5 = vector.broadcast %4 : vector<1x128xf32> to vector<64x128xf32>
    %6 = arith.subf %3, %5 : vector<64x128xf32>
    %c1 = arith.constant 1 : index
    %c0_6 = arith.constant 0 : index
    %7 = vector.load %arg4[%c1, %c0_6] : memref<2x128xf32, #tpu.memory_space<vmem>>, vector<1x128xf32>
    %8 = vector.broadcast %7 : vector<1x128xf32> to vector<64x128xf32>
    %9 = arith.mulf %6, %8 : vector<64x128xf32>
    %cst_7 = arith.constant 0.000000e+00 : f32
    %10 = vector.broadcast %cst_7 : f32 to vector<64x128xf32>
    %11 = arith.maximumf %9, %10 : vector<64x128xf32>
    %12 = arith.truncf %11 : vector<64x128xf32> to vector<64x128xbf16>
    %c0_8 = arith.constant 0 : index
    %c0_9 = arith.constant 0 : index
    %c0_10 = arith.constant 0 : index
    %13 = vector.load %arg5[%c0_8, %c0_9, %c0_10] : memref<1x64x128xbf16, #tpu.memory_space<vmem>>, vector<1x64x128xbf16>
    %14 = vector.shape_cast %13 : vector<1x64x128xbf16> to vector<64x128xbf16>
    %15 = vector.shape_cast %12 : vector<64x128xbf16> to vector<1x64x128xbf16>
    tpu.vector_store %arg5[%c0_8, %c0_9, %c0_10], %15 {strides = array<i32>} : memref<1x64x128xbf16, #tpu.memory_space<vmem>>, vector<1x64x128xbf16>,
    return
  }
  func.func @transform_0(%arg0: i32, %arg1: i32) -> (i32, i32, i32) {
    %c0_i32 = arith.constant 0 : i32
    %c0_i32_0 = arith.constant 0 : i32
    return %arg0, %arg1, %c0_i32 : i32, i32, i32
  }
  func.func @transform_1(%arg0: i32, %arg1: i32) -> (i32, i32) {
    %c0_i32 = arith.constant 0 : i32
    %c0_i32_0 = arith.constant 0 : i32
    %c0_i32_1 = arith.constant 0 : i32
    return %c0_i32, %c0_i32_0 : i32, i32
  }
  func.func @transform_2(%arg0: i32, %arg1: i32) -> (i32, i32) {
    %c0_i32 = arith.constant 0 : i32
    %c0_i32_0 = arith.constant 0 : i32
    %c0_i32_1 = arith.constant 0 : i32
    return %c0_i32, %c0_i32_0 : i32, i32
  }
  func.func @transform_3(%arg0: i32, %arg1: i32) -> (i32, i32, i32) {
    %c0_i32 = arith.constant 0 : i32
    %c0_i32_0 = arith.constant 0 : i32
    return %arg0, %arg1, %c0_i32 : i32, i32, i32
  }
}

</mosaic_0001>

<bundles_post_ra>
// kernel: basic_conv2d.2
= control target key start
LH: loop header
LB: loop body
LE: loop exit
PB: predicated region body
PF: predicated region fallthrough
CT: control target
= control target key end

     0   :  { %s581_s9 = smov 0   ;;  %s583_s10 = smov 0   ;;  %s650_s0 = inlined_call_operand.vmem [shape: bf16[2,256,36], index: 0, kind: input, shape index: {}]   ;;  %s651_s1 = inlined_call_operand.vmem [shape: bf16[36,128], index: 1, kind: input, shape index: {}]   ;;  %s652_s2 = inlined_call_operand.vmem [shape: f32[8,2,128], index: 2, kind: output, shape index: {}]  }
   0x1   :  { %s585_s11 = smov 0   ;;  %s587_s12 = smov 0  }
   0x2   :  { %s589_s13 = smov 0  }
   0x3 LB: > { %s21_s14 = sadd.s32 1, %s556_s11  ;;  %s24_s15 = sadd.s32 1, %s560_s12  ;;  %s564_s13 = sphi %s589_s13, %s12_s13   ;;  %s560_s12 = sphi %s587_s12, %s656_s12   ;;  %s556_s11 = sphi %s585_s11, %s655_s11   ;;  %s552_s10 = sphi %s583_s10, %s654_s10   ;;  %s548_s9 = sphi %s581_s9, %s653_s9  }
   0x4   : > { %p22_p0 = scmp.ge.s32.totalorder %s21_s14, 4  ;;  %p431_p1 = scmp.ge.s32.totalorder %s564_s13, 1 }
   0x5   : > { %p135_p2 = scmp.lt.s32.totalorder %s564_s13, 9 }
   0x6   : > { %s658_s14 = smov (%p22_p0, %s21_s14), 0  ;;  %s660_s15 = smov (!%p22_p0, %s24_s15), %s560_s12 }
   0x7   : > { %p136_p3 = pnand %p431_p1, %p135_p2  ;;  %p26_p4 = scmp.ge.s32.totalorder %s660_s15, 2 }
   0x8   : > { %s432_s20 = sshll.u32 (!%p136_p3), %s548_s9, 3  ;;  %p163_p5 = scmp.lt.s32.totalorder (!%p136_p3), %s552_s10, 1 }
   0x9   : > { %s662_s15 = smov (%p26_p4, %s660_s15), 0  ;;  %139 = sbr.rel (%p136_p3) target bundleno = 256 (0x100), region = 28 }
   0xa   : > { %p165_p6 = scmp.lt.s32.totalorder (!%p136_p3), %s432_s20, 31  ;;  %s435_s30 = sshll.u32 (!%p136_p3), %s552_s10, 2 }
   0xb   : > { %s173_s3 = sadd.s32 (!%p136_p3), %s548_s9, %s435_s30 }
   0xc   : > { %p174_p7 = scmp.lt.s32.totalorder (!%p136_p3), %s173_s3, 7 }
   0xe   : > { %v519_v0 = vld [vmem:[%s651_s1 + $0x10] ss:$0 sps:$4 sm:$0x33]   ;;  %vm242_vm0 = vcmask 1041408   ;;  %v520_v1 = vld [vmem:[%s651_s1 + $0x8] sm:$0xff]   ;;  %v521_v3 = vld [vmem:[%s651_s1] sm:$0xff]  }
   0xf   : > { %477 = vmatprep.subr.msk.bf16.mxu0 %vm242_vm0, %v519_v0  ;;  %v244_v2 = vsel %vm242_vm0, %v519_v0, 0  ;;  %478 = vmatprep.subr.msk.bf16.mxu1 %vm242_vm0, %v519_v0  ;;  %s164_s23 = scalar_select %p163_p5, %s552_s10, 1  ;;  %vm229_vm1 = vcmask 293888   ;;  %vm345_vm2 = vcmask 1040384  }
  0x10   : > { %458 = vmatpush3.bf16.msra.mxu0 %v244_v2  ;;  %474 = vmatpush3.bf16.msra.mxu1 %v244_v2  ;;  %s664_s20 = smov (!%p165_p6, %s432_s20), 31  ;;  %s666_s3 = smov (!%p174_p7, %s173_s3), 7 }
  0x11   : > { %459 = vmatprep.subr.bf16.mxu0 %v520_v1  ;;  %472 = vmatprep.subr.bf16.mxu1 %v520_v1  ;;  %s433_s24 = sshll.u32 %s164_s23, 5  ;;  %s436_s4 = sshll.u32 %s666_s3, 1 }
  0x12   : > { %s168_s25 = sadd.s32 %s433_s24, %s664_s20  ;;  %s177_s7 = scalar_lea.vmem %s652_s2, %s436_s4 }
  0x13   : > { %s434_s26 = sshll.u32 %s168_s25, 2 }
  0x14   : > { %460 = vmatpush3.bf16.msra.mxu0 %v520_v1  ;;  %475 = vmatpush3.bf16.msra.mxu1 %v520_v1  ;;  %s170_s29 = scalar_lea.vmem %s650_s0, %s434_s26 }
  0x15   : > { %461 = vmatprep.subr.bf16.mxu0 %v521_v3  ;;  %473 = vmatprep.subr.bf16.mxu1 %v521_v3  ;;  %v522_v4 = vld [vmem:[%s170_s29] sm:$0xff]   ;;  %v523_v5 = vld [vmem:[%s170_s29 + $0x8] sm:$0xff]   ;;  %v524_v6 = vld [vmem:[%s170_s29 + $0x10] sm:$0xff]  }
  0x16   : > { %463 = vmatprep.mubr.msk.bf16.mxu0 %vm229_vm1, %v522_v4  ;;  %v525_v7 = vld [vmem:[%s170_s29 + $0x18] sm:$0xff]   ;;  %467 = vmatprep.mubr.msk.bf16.mxu1 %vm229_vm1, %v524_v6 }
  0x18   : > { %462 = vmatpush3.bf16.msra.mxu0 %v521_v3  ;;  %476 = vmatpush3.bf16.msra.mxu1 %v521_v3 }
  0x1b   : > { %464 = vmatmul.mubr.msk.bf16.vlgmr.msra.gmra.mxu0 %vm229_vm1, %v523_v5  ;;  %468 = vmatmul.mubr.msk.bf16.vlgmr.msra.gmra.mxu1 %vm229_vm1, %v525_v7 }
  0xdb   : > { %v465_v8 = vpop.f32.mrf.mxu0  ;;  %v469_v10 = vpop.f32.mrf.mxu1 }
  0xdc   : > { %v326_v18 = vmul.f32 %v465_v8, %v465_v8  ;;  %v330_v31 = vmul.f32 %v469_v10, %v469_v10 }
  0xdd   : > { %v280_v9 = vpop.f32.mrf.mxu0  ;;  %v296_v12 = vpop.f32.mrf.mxu1 }
  0xde   : > { %v324_v14 = vmul.f32 %v280_v9, %v280_v9  ;;  %v328_v25 = vmul.f32 %v296_v12, %v296_v12 }
  0xdf   : > { %v466_v11 = vpop.f32.mrf.mxu0  ;;  %v470_v17 = vpop.f32.mrf.mxu1 }
  0xe0   : > { %v327_v21 = vmul.f32 %v466_v11, %v466_v11  ;;  %v331_v34 = vmul.f32 %v470_v17, %v470_v17 }
  0xe1   : > { %v283_v13 = vpop.f32.mrf.mxu0  ;;  %v299_v24 = vpop.f32.mrf.mxu1 }
  0xe2   : > { %v311_v15 = vadd.f32 %v283_v13, %v280_v9  ;;  %v325_v16 = vmul.f32 %v283_v13, %v283_v13  ;;  %v329_v29 = vmul.f32 %v299_v24, %v299_v24 }
  0xe4   : > { %v312_v19 = vadd.f32 %v465_v8, %v311_v15  ;;  %v332_v20 = vadd.f32 %v325_v16, %v324_v14 }
  0xe6   : > { %v333_v22 = vadd.f32 %v332_v20, %v326_v18  ;;  %v313_v23 = vadd.f32 %v466_v11, %v312_v19 }
  0xe8   : > { %v314_v26 = vadd.f32 %v313_v23, %v296_v12  ;;  %v334_v27 = vadd.f32 %v333_v22, %v327_v21 }
  0xea   : > { %v315_v28 = vadd.f32 %v314_v26, %v299_v24  ;;  %v335_v30 = vadd.f32 %v334_v27, %v328_v25 }
  0xec   : > { %v316_v32 = vadd.f32 %v469_v10, %v315_v28  ;;  %v336_v33 = vadd.f32 %v335_v30, %v329_v29 }
  0xee   : > { %v317_v35 = vadd.f32 %v470_v17, %v316_v32  ;;  %v337_v36 = vadd.f32 %v336_v33, %v330_v31 }
  0xf0   : > { %v318_v37 = vrot.slane %v317_v35, 4  ;;  %v338_v38 = vadd.f32 %v337_v36, %v331_v34 }
  0xf2   : > { %v319_v39 = vadd.f32 %v318_v37, %v317_v35  ;;  %v339_v40 = vrot.slane %v338_v38, 4 }
  0xf4   : > { %v320_v41 = vrot.slane %v319_v39, 2  ;;  %v340_v42 = vadd.f32 %v339_v40, %v338_v38 }
  0xf6   : > { %v321_v43 = vadd.f32 %v320_v41, %v319_v39  ;;  %v341_v44 = vrot.slane %v340_v42, 2 }
  0xf8   : > { %v322_v45 = vrot.slane %v321_v43, 1  ;;  %v342_v46 = vadd.f32 %v341_v44, %v340_v42 }
  0xfa   : > { %v343_v47 = vrot.slane %v342_v46, 1  ;;  %v323_v48 = vadd.f32 %v322_v45, %v321_v43 }
  0xfc   : > { %v344_v49 = vadd.f32 %v343_v47, %v342_v46 }
  0xfe   : > { %v346_v50 = vsel %vm345_vm2, %v323_v48, %v344_v49 }
  0xff   : > { %347 = vst [vmem:[%s177_s7] sm:$0x3] %v346_v50 }
 0x100 PF: > { %s12_s13 = sadd.s32 1, %s564_s13   ;;  %s653_s9 = smov %s556_s11 }
 0x101   : > { %p9_p8 = scmp.ge.s32.totalorder %s12_s13, 10   ;;  %s654_s10 = smov %s560_s12 }
 0x102   : > { %s655_s11 = smov %s658_s14  ;;  %s656_s12 = smov %s662_s15 }
 0x103   :  { %11 = sbr.rel (!%p9_p8) target bundleno = 3 (0x3), region = 58 }

// kernel: basic_conv2d.3
= control target key start
LH: loop header
LB: loop body
LE: loop exit
PB: predicated region body
PF: predicated region fallthrough
CT: control target
= control target key end

     0   :  { %s706_s12 = smov 0   ;;  %s708_s13 = smov 0   ;;  %s782_s0 = inlined_call_operand.vmem [shape: bf16[2,256,36], index: 0, kind: input, shape index: {}]   ;;  %s783_s1 = inlined_call_operand.vmem [shape: bf16[36,128], index: 1, kind: input, shape index: {}]   ;;  %s784_s2 = inlined_call_operand.vmem [shape: f32[2,128], index: 2, kind: input, shape index: {}]   ;;  %s785_s3 = inlined_call_operand.vmem [shape: bf16[2,256,128], index: 3, kind: output, shape index: {}]  }
   0x1   :  { %s710_s14 = smov 0   ;;  %s712_s15 = smov 0  }
   0x2   :  { %s714_s16 = smov 0  }
   0x3 LB: > { %s22_s17 = sadd.s32 1, %s676_s14  ;;  %s25_s18 = sadd.s32 1, %s680_s15  ;;  %s684_s16 = sphi %s714_s16, %s13_s16   ;;  %s680_s15 = sphi %s712_s15, %s789_s15   ;;  %s676_s14 = sphi %s710_s14, %s788_s14   ;;  %s672_s13 = sphi %s708_s13, %s787_s13   ;;  %s668_s12 = sphi %s706_s12, %s786_s12  }
   0x4   : > { %p23_p0 = scmp.ge.s32.totalorder %s22_s17, 4  ;;  %p509_p1 = scmp.ge.s32.totalorder %s684_s16, 1 }
   0x5   : > { %p158_p2 = scmp.lt.s32.totalorder %s684_s16, 9 }
   0x6   : > { %s791_s17 = smov (%p23_p0, %s22_s17), 0  ;;  %s793_s18 = smov (!%p23_p0, %s25_s18), %s680_s15 }
   0x7   : > { %p159_p3 = pnand %p509_p1, %p158_p2  ;;  %p27_p4 = scmp.ge.s32.totalorder %s793_s18, 2 }
   0x8   : > { %s510_s23 = sshll.u32 (!%p159_p3), %s668_s12, 3  ;;  %p191_p5 = scmp.lt.s32.totalorder (!%p159_p3), %s672_s13, 1 }
   0x9   : > { %s795_s18 = smov (%p27_p4, %s793_s18), 0  ;;  %162 = sbr.rel (%p159_p3) target bundleno = 235 (0xeb), region = 32 }
   0xa   : > { %p193_p6 = scmp.lt.s32.totalorder (!%p159_p3), %s510_s23, 31 }
   0xe   : > { %v639_v0 = vld [vmem:[%s783_s1 + $0x10] ss:$0 sps:$4 sm:$0x33]   ;;  %vm272_vm0 = vcmask 1041408   ;;  %v640_v1 = vld [vmem:[%s783_s1 + $0x8] sm:$0xff]   ;;  %v641_v3 = vld [vmem:[%s783_s1] sm:$0xff]  }
   0xf   : > { %597 = vmatprep.subr.msk.bf16.mxu0 %vm272_vm0, %v639_v0  ;;  %598 = vmatprep.subr.msk.bf16.mxu1 %vm272_vm0, %v639_v0  ;;  %v274_v2 = vsel %vm272_vm0, %v639_v0, 0  ;;  %s797_s13 = smov (!%p191_p5, %s672_s13), 1  ;;  %s799_s23 = smov (!%p193_p6, %s510_s23), 31  ;;  %vm259_vm1 = vcmask 293888   ;;  %v527_v8 = vld [vmem:[%s784_s2] ss:$0 sm:$0xff] }
  0x10   : > { %578 = vmatpush3.bf16.msra.mxu0 %v274_v2  ;;  %594 = vmatpush3.bf16.msra.mxu1 %v274_v2  ;;  %s511_s26 = sshll.u32 %s797_s13, 5  ;;  %v528_v12 = vld [vmem:[%s784_s2 + $0x1] ss:$0 sm:$0xff] }
  0x11   : > { %579 = vmatprep.subr.bf16.mxu0 %v640_v1  ;;  %592 = vmatprep.subr.bf16.mxu1 %v640_v1  ;;  %s748_s27 = sadd.s32 %s511_s26, %s799_s23 }
  0x12   : > { %s512_s28 = sshll.u32 %s748_s27, 2 }
  0x13   : > { %s198_s4 = scalar_lea.vmem %s782_s0, %s512_s28  ;;  %s208_s11 = scalar_lea.vmem %s785_s3, %s512_s28 }
  0x14   : > { %580 = vmatpush3.bf16.msra.mxu0 %v640_v1  ;;  %595 = vmatpush3.bf16.msra.mxu1 %v640_v1  ;;  %v642_v4 = vld [vmem:[%s198_s4] sm:$0xff]   ;;  %v643_v5 = vld [vmem:[%s198_s4 + $0x10] sm:$0xff]   ;;  %v644_v6 = vld [vmem:[%s198_s4 + $0x8] sm:$0xff]  }
  0x15   : > { %581 = vmatprep.subr.bf16.mxu0 %v641_v3  ;;  %593 = vmatprep.subr.bf16.mxu1 %v641_v3  ;;  %v645_v7 = vld [vmem:[%s198_s4 + $0x18] sm:$0xff]  }
  0x16   : > { %583 = vmatprep.mubr.msk.bf16.mxu0 %vm259_vm1, %v642_v4  ;;  %587 = vmatprep.mubr.msk.bf16.mxu1 %vm259_vm1, %v643_v5 }
  0x18   : > { %582 = vmatpush3.bf16.msra.mxu0 %v641_v3  ;;  %596 = vmatpush3.bf16.msra.mxu1 %v641_v3 }
  0x1b   : > { %584 = vmatmul.mubr.msk.bf16.vlgmr.msra.gmra.mxu0 %vm259_vm1, %v644_v6  ;;  %588 = vmatmul.mubr.msk.bf16.vlgmr.msra.gmra.mxu1 %vm259_vm1, %v645_v7 }
  0xdb   : > { %v585_v9 = vpop.f32.mrf.mxu0  ;;  %v589_v11 = vpop.f32.mrf.mxu1 }
  0xdc   : > { %v348_v10 = vsub.f32 %v585_v9, %v527_v8  ;;  %v352_v13 = vsub.f32 %v589_v11, %v527_v8 }
  0xdd   : > { %v310_v14 = vpop.f32.mrf.mxu0  ;;  %v326_v16 = vpop.f32.mrf.mxu1 }
  0xde   : > { %v346_v15 = vsub.f32 %v310_v14, %v527_v8  ;;  %v350_v17 = vsub.f32 %v326_v16, %v527_v8  ;;  %v361_v19 = vmul.f32 %v528_v12, %v348_v10  ;;  %v365_v22 = vmul.f32 %v528_v12, %v352_v13 }
  0xdf   : > { %v586_v18 = vpop.f32.mrf.mxu0  ;;  %v590_v21 = vpop.f32.mrf.mxu1 }
  0xe0   : > { %v349_v20 = vsub.f32 %v586_v18, %v527_v8  ;;  %v353_v23 = vsub.f32 %v590_v21, %v527_v8  ;;  %v359_v25 = vmul.f32 %v528_v12, %v346_v15  ;;  %v363_v29 = vmul.f32 %v528_v12, %v350_v17 }
  0xe1   : > { %v313_v24 = vpop.f32.mrf.mxu0  ;;  %v329_v28 = vpop.f32.mrf.mxu1  ;;  %v369_v32 = vmax.f32 %v361_v19, 0.0  ;;  %v373_v35 = vmax.f32 %v365_v22, 0.0 }
  0xe2   : > { %v362_v26 = vmul.f32 %v528_v12, %v349_v20  ;;  %v347_v27 = vsub.f32 %v313_v24, %v527_v8  ;;  %v366_v30 = vmul.f32 %v528_v12, %v353_v23  ;;  %v351_v31 = vsub.f32 %v329_v28, %v527_v8 }
  0xe3   : > { %v367_v38 = vmax.f32 %v359_v25, 0.0  ;;  %v371_v41 = vmax.f32 %v363_v29, 0.0 }
  0xe4   : > { %v370_v33 = vmax.f32 %v362_v26, 0.0  ;;  %v360_v34 = vmul.f32 %v528_v12, %v347_v27  ;;  %v374_v36 = vmax.f32 %v366_v30, 0.0  ;;  %v364_v37 = vmul.f32 %v528_v12, %v351_v31 }
  0xe6   : > { %v555_v39 = vpack.c.bf16 %v370_v33, %v369_v32  ;;  %v368_v40 = vmax.f32 %v360_v34, 0.0  ;;  %v565_v42 = vpack.c.bf16 %v374_v36, %v373_v35  ;;  %v372_v43 = vmax.f32 %v364_v37, 0.0 }
  0xe8   : > { %567 = vst [vmem:[%s208_s11 + $0x8] sm:$0xff] %v555_v39   ;;  %v550_v44 = vpack.c.bf16 %v368_v40, %v367_v38  ;;  %569 = vst [vmem:[%s208_s11 + $0x18] sm:$0xff] %v565_v42   ;;  %v560_v45 = vpack.c.bf16 %v372_v43, %v371_v41 }
  0xea   : > { %551 = vst [vmem:[%s208_s11] sm:$0xff] %v550_v44   ;;  %568 = vst [vmem:[%s208_s11 + $0x10] sm:$0xff] %v560_v45  }
  0xeb PF: > { %s13_s16 = sadd.s32 1, %s684_s16   ;;  %s786_s12 = smov %s676_s14 }
  0xec   : > { %p10_p7 = scmp.ge.s32.totalorder %s13_s16, 10   ;;  %s787_s13 = smov %s680_s15 }
  0xed   : > { %s788_s14 = smov %s791_s17  ;;  %s789_s15 = smov %s795_s18 }
  0xee   :  { %12 = sbr.rel (!%p10_p7) target bundleno = 3 (0x3), region = 62 }

</bundles_post_ra>
